<compile_context>
chip_gen: v5e
topology: v5e:2x2
jax: 0.10.0
libtpu: 0.0.40
codegen_flags: <defaults>
</compile_context>

<pallas_src>
import math
import functools

import jax
import jax.numpy as jnp
from jax.experimental import pallas as pl
from jax.experimental.pallas import tpu as pltpu

_KERNEL_MIN_BYTES = 4 * 1024 * 1024      # below this, plain XLA einsum beats pallas_call overhead
_MAX_STEP_BYTES = 16 * 1024 * 1024       # cap on per-grid-step in+out tile bytes
_MAX_BLOCK_ROWS = 65536                  # sanity cap on rows per block
_FALLBACK_PHYS_VMEM = 64 * 1024 * 1024   # v7x-sized fallback: safe on every generation


@functools.lru_cache(maxsize=None)
def _vmem_budget():
    """(double-buffered working-set budget, vmem_limit_bytes), sized from physical VMEM."""
    try:
        phys = int(pltpu.get_tpu_info().vmem_capacity_bytes)
        if phys <= 0:
            phys = _FALLBACK_PHYS_VMEM
    except Exception:
        phys = _FALLBACK_PHYS_VMEM
    budget = min(int(phys * 0.6), 96 * 1024 * 1024)        # working set target
    limit = min(phys - (8 << 20), budget + (16 << 20))     # headroom for compiler scratch
    return int(budget), int(limit)


def _derive_block_rows(rows, cin, fout, itemsize, budget):
    """Largest row tile (multiple of 8) that (a) fits the VMEM budget double-buffered,
    (b) keeps per-step traffic <= _MAX_STEP_BYTES, and (c) leaves >= 2 grid steps when
    possible so the 'parallel' row axis can shard across v7x's two TensorCores."""
    per_row_db = 2 * (cin + fout) * itemsize                 # double-buffered in + out, per row
    fixed = (2 * cin * fout + 2 * fout) * itemsize           # weight (2x buffered) + bias
    by_budget = max(budget - fixed, 8 * per_row_db) // per_row_db
    by_step = _MAX_STEP_BYTES // ((cin + fout) * itemsize)
    br = min(by_budget, by_step, _MAX_BLOCK_ROWS)
    br = max(8, (br // 8) * 8)
    if rows >= 16:
        half = max(8, (((rows + 1) // 2) + 7) // 8 * 8)      # ~ceil(rows/2), rounded up to x8
        br = min(br, half)                                   # guarantees grid >= 2 steps
    if rows <= br:
        br = rows                                            # full-extent block (exempt from x8)
    return int(br)


def _pim_kernel(x_ref, w_ref, b_ref, o_ref):
    # x_ref: (TM, Cin)   w_ref: (Cin, Fout)   b_ref: (1, Fout)   o_ref: (TM, Fout)
    y = jnp.dot(x_ref[...], w_ref[...], preferred_element_type=jnp.float32)
    o_ref[...] = (y + b_ref[...].astype(jnp.float32)).astype(o_ref.dtype)


def _linear_slab(x2, wt, b2, *, block_rows, vmem_limit):
    """(rows, Cin) @ (Cin, Fout) + (1, Fout) -> (rows, Fout) via a row-tiled Pallas kernel."""
    rows, cin = x2.shape
    fout = wt.shape[1]
    grid = (pl.cdiv(rows, block_rows),)

    return pl.pallas_call(
        _pim_kernel,
        out_shape=jax.ShapeDtypeStruct((rows, fout), x2.dtype),
        grid_spec=pltpu.PrefetchScalarGridSpec(
            num_scalar_prefetch=0,
            grid=grid,
            in_specs=[
                pl.BlockSpec((block_rows, cin), lambda i: (i, 0)),
                pl.BlockSpec((cin, fout), lambda i: (0, 0)),
                pl.BlockSpec((1, fout), lambda i: (0, 0)),
            ],
            out_specs=pl.BlockSpec((block_rows, fout), lambda i: (i, 0)),
        ),
        compiler_params=pltpu.CompilerParams(
            dimension_semantics=("parallel",),
            vmem_limit_bytes=int(vmem_limit),
        ),
    )(x2, wt, b2)


def permutation_invariance_forward(x, weight, bias=None, *, use_kernel=None):
    """Equivalent of PermutationInvarianceModule.forward.

    x:      (N, *, channels)    weight: (features, channels)    bias: (channels,) or None
    returns the x.unsqueeze(2)-shaped output with last dim = features (3-D x -> (N, S, 1, F))
    """
    features, channels = weight.shape
    orig_shape = x.shape
    assert orig_shape[-1] == channels, (orig_shape, weight.shape)
    if bias is not None:
        assert bias.shape == (channels,), bias.shape
        # A (channels,) bias must broadcast against a (..., features) output.
        assert channels == features or channels == 1, (
            "bias of shape (channels,) only broadcasts when channels == features or channels == 1")

    rows = int(math.prod(orig_shape[:-1]))
    x2 = x.reshape(rows, channels)
    itemsize = jnp.dtype(x.dtype).itemsize

    eff_bias = (jnp.broadcast_to(bias, (features,)).astype(x.dtype) if bias is not None
                else jnp.zeros((features,), dtype=x.dtype))

    if use_kernel is None:
        use_kernel = rows * max(channels, features) * itemsize >= _KERNEL_MIN_BYTES

    if not use_kernel:
        # tiny problem: pallas_call launch + DMA setup dwarfs the work
        out2 = x2 @ weight.T.astype(x.dtype) + eff_bias[None, :]
    else:
        budget, vmem_limit = _vmem_budget()
        wt = weight.T.astype(x.dtype)   # (channels, features): contract on last dim, no in-kernel transpose

        # lane-dense packing: fold k rows into one 128-wide super row (output stores are
        # unmasked full-lane). Only requires 128 % features == 0 — not channels == features.
        k = 128 // features if (0 < features < 128 and 128 % features == 0) else 1
        if k > 1 and rows >= k:
            n_packed = (rows // k) * k
            rows_g = n_packed // k
            x_main = x2 if n_packed == rows else jax.lax.slice_in_dim(x2, 0, n_packed, axis=0)
            xg = x_main.reshape(rows_g, k * channels)
            wg = jnp.kron(jnp.eye(k, dtype=wt.dtype), wt)          # (k*C, k*F) block-diagonal
            bg = jnp.tile(eff_bias, k).reshape(1, k * features)
            block_rows = _derive_block_rows(rows_g, k * channels, k * features, itemsize, budget)
            main = _linear_slab(xg, wg, bg, block_rows=block_rows,
                                vmem_limit=vmem_limit).reshape(n_packed, features)
            if n_packed == rows:
                out2 = main
            else:
                # only the < k leftover rows take the slow path (plain XLA), then stitch
                tail = x2[n_packed:] @ wt + eff_bias[None, :]
                out2 = jnp.concatenate([main, tail.astype(main.dtype)], axis=0)
        else:
            # general (unpacked) path — block_rows still sized to fill the VMEM budget
            block_rows = _derive_block_rows(rows, channels, features, itemsize, budget)
            out2 = _linear_slab(x2, wt, eff_bias.reshape(1, features),
                                block_rows=block_rows, vmem_limit=vmem_limit)

    out_nd = out2.reshape(orig_shape[:-1] + (features,))
    # input.unsqueeze(2) -> singleton axis at position 2 of the output
    return jnp.expand_dims(out_nd, axis=2)


def init_params(key, channels, features, dtype=jnp.float32):
    """Deterministic re-implementation of reset_parameters().

    kaiming_uniform_(a=sqrt(5)) on weight (features, channels): bound = 1/sqrt(channels)
    bias: U(-1/sqrt(fan_in), 1/sqrt(fan_in)), fan_in = channels
    """
    kw, kb = jax.random.split(key)
    bound = 1.0 / math.sqrt(channels)
    weight = jax.random.uniform(kw, (features, channels), dtype=dtype, minval=-bound, maxval=bound)
    bias = jax.random.uniform(kb, (channels,), dtype=dtype, minval=-bound, maxval=bound)
    return weight, bias


if __name__ == "__main__":
    key = jax.random.PRNGKey(0)
    k_params, k_x1, k_x2, k_p2, k_x3 = jax.random.split(key, 5)

    fwd = jax.jit(functools.partial(permutation_invariance_forward, use_kernel=True))

    # Case 1: packed path, rows % k == 0  (C = F = 8, k = 16, rows = 32)
    channels = features = 8
    batch, seq = 2, 16
    weight, bias = init_params(k_params, channels, features, dtype=jnp.float32)
    x = jax.random.normal(k_x1, (batch, seq, channels), dtype=jnp.float32)
    out = jax.block_until_ready(fwd(x, weight, bias))
    ref = jnp.einsum("nsc,fc->nsf", x, weight)[:, :, None, :] + bias.reshape(1, 1, 1, -1)
    assert out.shape == (batch, seq, 1, features), out.shape
    assert jnp.allclose(out, ref, atol=1e-5, rtol=1e-5), float(jnp.max(jnp.abs(out - ref)))

    # Case 2: rows % k != 0 -> packed main slab + tiny XLA tail stitch (rows = 30, k = 16)
    x_b = jax.random.normal(k_x2, (batch, 15, channels), dtype=jnp.float32)
    out_b = jax.block_until_ready(fwd(x_b, weight, bias))
    ref_b = jnp.einsum("nsc,fc->nsf", x_b, weight)[:, :, None, :] + bias.reshape(1, 1, 1, -1)
    assert out_b.shape == (batch, 15, 1, features), out_b.shape
    assert jnp.allclose(out_b, ref_b, atol=1e-5, rtol=1e-5), float(jnp.max(jnp.abs(out_b - ref_b)))

    # Case 3: 128 % features != 0 -> general unpacked kernel path (C = F = 12, grid of 2 steps)
    c3 = f3 = 12
    w3, b3 = init_params(k_p2, c3, f3, dtype=jnp.float32)
    x3 = jax.random.normal(k_x3, (batch, 16, c3), dtype=jnp.float32)
    out3 = jax.block_until_ready(fwd(x3, w3, b3))
    ref3 = jnp.einsum("nsc,fc->nsf", x3, w3)[:, :, None, :] + b3.reshape(1, 1, 1, -1)
    assert out3.shape == (batch, 16, 1, f3), out3.shape
    assert jnp.allclose(out3, ref3, atol=1e-5, rtol=1e-5), float(jnp.max(jnp.abs(out3 - ref3)))

    print("KERNEL_OK")
</pallas_src>

<mosaic_0001>
module attributes {stable_mosaic.version = 11 : i64} {
  func.func @_pim_kernel(%arg0: i32, %arg1: memref<2x128xf32, #tpu.memory_space<vmem>>, %arg2: memref<128x128xf32, #tpu.memory_space<vmem>>, %arg3: memref<1x128xf32, #tpu.memory_space<vmem>>, %arg4: memref<2x128xf32, #tpu.memory_space<vmem>>) attributes {dimension_semantics = [#tpu.dimension_semantics<parallel>], iteration_bounds = array<i64: 1>, scalar_prefetch = 0 : i64, scratch_operands = 0 : i64, tpu.core_type = #tpu.core_type<tc>, window_params = [{transform_indices = @transform_0, window_bounds = array<i64: 2, 128>}, {pipeline_mode = #tpu.pipeline_mode<synchronous>, transform_indices = @transform_1, window_bounds = array<i64: 128, 128>}, {pipeline_mode = #tpu.pipeline_mode<synchronous>, transform_indices = @transform_2, window_bounds = array<i64: 1, 128>}, {transform_indices = @transform_3, window_bounds = array<i64: 2, 128>}]} {
    %c0 = arith.constant 0 : index
    %c0_0 = arith.constant 0 : index
    %0 = vector.load %arg1[%c0, %c0_0] : memref<2x128xf32, #tpu.memory_space<vmem>>, vector<2x128xf32>
    %c0_1 = arith.constant 0 : index
    %c0_2 = arith.constant 0 : index
    %1 = vector.load %arg2[%c0_1, %c0_2] : memref<128x128xf32, #tpu.memory_space<vmem>>, vector<128x128xf32>
    %cst = arith.constant dense<0.000000e+00> : vector<2x128xf32>
    %2 = tpu.matmul %0, %1, %cst {dimension_numbers = #tpu.dot_dimension_numbers<[1], [0], [0], [1], [0, 0, 1, 1], [], []>} : vector<2x128xf32>, vector<128x128xf32>, vector<2x128xf32> -> vector<2x128xf32>
    %c0_3 = arith.constant 0 : index
    %c0_4 = arith.constant 0 : index
    %3 = vector.load %arg3[%c0_3, %c0_4] : memref<1x128xf32, #tpu.memory_space<vmem>>, vector<1x128xf32>
    %4 = vector.broadcast %3 : vector<1x128xf32> to vector<2x128xf32>
    %5 = arith.addf %2, %4 : vector<2x128xf32>
    %c0_5 = arith.constant 0 : index
    %c0_6 = arith.constant 0 : index
    %6 = vector.load %arg4[%c0_5, %c0_6] : memref<2x128xf32, #tpu.memory_space<vmem>>, vector<2x128xf32>
    tpu.vector_store %arg4[%c0_5, %c0_6], %5 {strides = array<i32>} : memref<2x128xf32, #tpu.memory_space<vmem>>, vector<2x128xf32>,
    return
  }
  func.func @transform_0(%arg0: i32) -> (i32, i32) {
    %c0_i32 = arith.constant 0 : i32
    %c0_i32_0 = arith.constant 0 : i32
    return %arg0, %c0_i32 : i32, i32
  }
  func.func @transform_1(%arg0: i32) -> (i32, i32) {
    %c0_i32 = arith.constant 0 : i32
    %c0_i32_0 = arith.constant 0 : i32
    %c0_i32_1 = arith.constant 0 : i32
    return %c0_i32, %c0_i32_0 : i32, i32
  }
  func.func @transform_2(%arg0: i32) -> (i32, i32) {
    %c0_i32 = arith.constant 0 : i32
    %c0_i32_0 = arith.constant 0 : i32
    %c0_i32_1 = arith.constant 0 : i32
    return %c0_i32, %c0_i32_0 : i32, i32
  }
  func.func @transform_3(%arg0: i32) -> (i32, i32) {
    %c0_i32 = arith.constant 0 : i32
    %c0_i32_0 = arith.constant 0 : i32
    return %arg0, %c0_i32 : i32, i32
  }
}

</mosaic_0001>

<bundles_post_ra>
// kernel: tile.8
= control target key start
LH: loop header
LB: loop body
LE: loop exit
PB: predicated region body
PF: predicated region fallthrough
CT: control target
= control target key end

     0   :  { %s28_s0 = inlined_call_operand.vmem [shape: f32[8], index: 0, kind: input, shape index: {}]   ;;  %s29_s1 = inlined_call_operand.vmem [shape: f32[16,8], index: 1, kind: output, shape index: {}]  }
   0x1   :  { %v4_v0 = vld [vmem:[%s28_s0] ss:$0 sm:$0xff] }
   0x2   :  { %5 = vst [vmem:[%s29_s1] sm:$0xff] %v4_v0 }
   0x3   :  { %8 = vst [vmem:[%s29_s1 + $0x8] sm:$0xff] %v4_v0 }

// kernel: tile.9
= control target key start
LH: loop header
LB: loop body
LE: loop exit
PB: predicated region body
PF: predicated region fallthrough
CT: control target
= control target key end

     0   :  { %s131_s10 = smov 120   ;;  %s132_s11 = smov 104   ;;  %vm3_vm0 = vcmask 64512   ;;  %vm9_vm1 = vcmask 1048512   ;;  %vm15_vm2 = vcmask 982912   ;;  %vm21_vm3 = vcmask 917312   ;;  %s207_s0 = inlined_call_operand.vmem [shape: f32[16,8], index: 0, kind: input, shape index: {}]   ;;  %s208_s1 = inlined_call_operand.vmem [shape: f32[1,128], index: 1, kind: output, shape index: {}]  }
   0x1   :  { %v101_v0 = vld [vmem:[%s207_s0 + $0xf] sm:$0x1]   ;;  %v103_v1 = vld [vmem:[%s207_s0 + $0xd] sm:$0x1]   ;;  %v105_v2 = vld [vmem:[%s207_s0 + $0xb] sm:$0x1]  }
   0x2   :  { %7 = vrot.lane.b32.xlu0 %v101_v0, %s131_s10  ;;  %19 = vrot.lane.b32.xlu1 %v103_v1, %s132_s11  ;;  %s133_s14 = smov 88   ;;  %v102_v3 = vld [vmem:[%s207_s0 + $0xe] sm:$0x1]   ;;  %v104_v4 = vld [vmem:[%s207_s0 + $0xc] sm:$0x1]   ;;  %s134_s19 = smov 112  }
   0x3   :  { %31 = vrot.lane.b32.xlu2 %v105_v2, %s133_s14  ;;  %s135_s20 = smov 96   ;;  %v106_v5 = vld [vmem:[%s207_s0 + $0xa] sm:$0x1]   ;;  %s136_s23 = smov 80   ;;  %v107_v6 = vld [vmem:[%s207_s0 + $0x9] sm:$0x1]  }
   0x4   :  { %v108_v7 = vld [vmem:[%s207_s0 + $0x8] sm:$0x1]   ;;  %s137_s28 = smov 72   ;;  %s138_s29 = smov 64   ;;  %v109_v8 = vld [vmem:[%s207_s0 + $0x7] sm:$0x1]  }
   0x5   :  { %s139_s3 = smov 56   ;;  %v110_v9 = vld [vmem:[%s207_s0 + $0x6] sm:$0x1]   ;;  %v111_v10 = vld [vmem:[%s207_s0 + $0x5] sm:$0x1]   ;;  %s140_s8 = smov 48  }
   0x6   :  { %s141_s9 = smov 40   ;;  %v112_v11 = vld [vmem:[%s207_s0 + $0x4] sm:$0x1]   ;;  %s142_s12 = smov 32   ;;  %v113_v12 = vld [vmem:[%s207_s0 + $0x3] sm:$0x1]  }
   0x7   :  { %v114_v13 = vld [vmem:[%s207_s0 + $0x2] sm:$0x1]   ;;  %s143_s17 = smov 24   ;;  %s144_s18 = smov 16   ;;  %v115_v14 = vld [vmem:[%s207_s0 + $0x1] sm:$0x1]  }
   0x8   :  { %s145_s21 = smov 8   ;;  %v2_v15 = vld [vmem:[%s207_s0] sm:$0x1]   ;;  %vm27_vm4 = vcmask 851712   ;;  %vm33_vm5 = vcmask 786112   ;;  %vm39_vm6 = vcmask 720512  }
   0x9   :  { %4 = vst.msk [vmem:[#allocation0] sm:$0x1] %vm3_vm0, %v2_v15   ;;  %vm45_vm7 = vcmask 654912   ;;  %vm51_vm8 = vcmask 589312   ;;  %vm57_vm9 = vcmask 523712   ;;  %vm63_vm10 = vcmask 458112  }
   0xa   :  { %13 = vrot.lane.b32.xlu0 %v102_v3, %s134_s19  ;;  %25 = vrot.lane.b32.xlu1 %v104_v4, %s135_s20  ;;  %vm69_vm11 = vcmask 392512   ;;  %vm75_vm12 = vcmask 326912   ;;  %vm81_vm13 = vcmask 261312   ;;  %vm87_vm14 = vcmask 195712  }
   0xb   :  { %37 = vrot.lane.b32.xlu2 %v106_v5, %s136_s23  ;;  %vm93_vm15 = vcmask 130112  }
  0x12   :  { %43 = vrot.lane.b32.xlu0 %v107_v6, %s137_s28  ;;  %49 = vrot.lane.b32.xlu1 %v108_v7, %s138_s29 }
  0x13   :  { %55 = vrot.lane.b32.xlu2 %v109_v8, %s139_s3 }
  0x1a   :  { %61 = vrot.lane.b32.xlu0 %v110_v9, %s140_s8  ;;  %67 = vrot.lane.b32.xlu1 %v111_v10, %s141_s9 }
  0x1b   :  { %73 = vrot.lane.b32.xlu2 %v112_v11, %s142_s12 }
  0x22   :  { %79 = vrot.lane.b32.xlu0 %v113_v12, %s143_s17  ;;  %85 = vrot.lane.b32.xlu1 %v114_v13, %s144_s18 }
  0x23   :  { %91 = vrot.lane.b32.xlu2 %v115_v14, %s145_s21 }
  0x5d   :  { %v32_v16 = vpop.permute.xlu2 %31  }
  0x65   :  { %v38_v17 = vpop.permute.xlu2 %37  }
  0x6d   :  { %v56_v18 = vpop.permute.xlu2 %55  }
  0x74   :  { %v8_v19 = vpop.permute.xlu0 %7   ;;  %v20_v20 = vpop.permute.xlu1 %19  }
  0x75   :  { %10 = vst.msk [vmem:[#allocation0] sm:$0x1] %vm9_vm1, %v8_v19   ;;  %v74_v21 = vpop.permute.xlu2 %73  }
  0x7c   :  { %v14_v22 = vpop.permute.xlu0 %13   ;;  %v26_v23 = vpop.permute.xlu1 %25  }
  0x7d   :  { %16 = vst.msk [vmem:[#allocation0] sm:$0x1] %vm15_vm2, %v14_v22   ;;  %v92_v24 = vpop.permute.xlu2 %91  }
  0x7e   :  { %22 = vst.msk [vmem:[#allocation0] sm:$0x1] %vm21_vm3, %v20_v20  }
  0x7f   :  { %28 = vst.msk [vmem:[#allocation0] sm:$0x1] %vm27_vm4, %v26_v23  }
  0x80   :  { %34 = vst.msk [vmem:[#allocation0] sm:$0x1] %vm33_vm5, %v32_v16  }
  0x81   :  { %40 = vst.msk [vmem:[#allocation0] sm:$0x1] %vm39_vm6, %v38_v17  }
  0x84   :  { %v44_v25 = vpop.permute.xlu0 %43   ;;  %v50_v26 = vpop.permute.xlu1 %49  }
  0x85   :  { %46 = vst.msk [vmem:[#allocation0] sm:$0x1] %vm45_vm7, %v44_v25  }
  0x86   :  { %52 = vst.msk [vmem:[#allocation0] sm:$0x1] %vm51_vm8, %v50_v26  }
  0x87   :  { %58 = vst.msk [vmem:[#allocation0] sm:$0x1] %vm57_vm9, %v56_v18  }
  0x8c   :  { %v62_v27 = vpop.permute.xlu0 %61   ;;  %v68_v28 = vpop.permute.xlu1 %67  }
  0x8d   :  { %64 = vst.msk [vmem:[#allocation0] sm:$0x1] %vm63_vm10, %v62_v27  }
  0x8e   :  { %70 = vst.msk [vmem:[#allocation0] sm:$0x1] %vm69_vm11, %v68_v28  }
  0x8f   :  { %76 = vst.msk [vmem:[#allocation0] sm:$0x1] %vm75_vm12, %v74_v21  }
  0x94   :  { %v80_v29 = vpop.permute.xlu0 %79   ;;  %v86_v30 = vpop.permute.xlu1 %85  }
  0x95   :  { %82 = vst.msk [vmem:[#allocation0] sm:$0x1] %vm81_vm13, %v80_v29  }
  0x96   :  { %88 = vst.msk [vmem:[#allocation0] sm:$0x1] %vm87_vm14, %v86_v30  }
  0x97   :  { %94 = vst.msk [vmem:[#allocation0] sm:$0x1] %vm93_vm15, %v92_v24  }
  0x9e   :  { %v97_v31 = vld [vmem:[#allocation0] sm:$0x1] }
  0x9f   :  { %100 = vst [vmem:[%s208_s1] sm:$0x1] %v97_v31 }

// kernel: permutation_invariance_forward.1
= control target key start
LH: loop header
LB: loop body
LE: loop exit
PB: predicated region body
PF: predicated region fallthrough
CT: control target
= control target key end

     0   :  { %s138_s1 = inlined_call_operand.vmem [shape: f32[128,128], index: 1, kind: input, shape index: {}]   ;;  %s139_s2 = inlined_call_operand.vmem [shape: f32[1,128], index: 2, kind: input, shape index: {}]   ;;  %s140_s0 = inlined_call_operand.vmem [shape: f32[2,128], index: 0, kind: input, shape index: {}]   ;;  %s141_s3 = inlined_call_operand.vmem [shape: f32[2,128], index: 3, kind: output, shape index: {}]  }
   0x1   :  { %v30_v0 = vld [vmem:[%s138_s1 + $0x78] sm:$0xff]  ;;  %v29_v1 = vld [vmem:[%s138_s1 + $0x70] sm:$0xff]  ;;  %v28_v2 = vld [vmem:[%s138_s1 + $0x68] sm:$0xff] }
   0x2   :  { %35 = vmatpush.msra.mxu0 %v30_v0  ;;  %v27_v3 = vld [vmem:[%s138_s1 + $0x60] sm:$0xff]  ;;  %v26_v4 = vld [vmem:[%s138_s1 + $0x58] sm:$0xff]  ;;  %v25_v5 = vld [vmem:[%s138_s1 + $0x50] sm:$0xff] }
   0x3   :  { %v24_v6 = vld [vmem:[%s138_s1 + $0x48] sm:$0xff]  ;;  %v23_v7 = vld [vmem:[%s138_s1 + $0x40] sm:$0xff]  ;;  %v22_v8 = vld [vmem:[%s138_s1 + $0x38] sm:$0xff] }
   0x4   :  { %36 = vmatpush.msra.mxu0 %v29_v1  ;;  %v21_v9 = vld [vmem:[%s138_s1 + $0x30] sm:$0xff]  ;;  %v20_v10 = vld [vmem:[%s138_s1 + $0x28] sm:$0xff]  ;;  %v19_v11 = vld [vmem:[%s138_s1 + $0x20] sm:$0xff] }
   0x5   :  { %v18_v12 = vld [vmem:[%s138_s1 + $0x18] sm:$0xff]  ;;  %v17_v13 = vld [vmem:[%s138_s1 + $0x10] sm:$0xff]  ;;  %v16_v14 = vld [vmem:[%s138_s1 + $0x8] sm:$0xff] }
   0x6   :  { %37 = vmatpush.msra.mxu0 %v28_v2  ;;  %v15_v15 = vld [vmem:[%s138_s1] sm:$0xff] }
   0x7   :  { %v14_v16 = vld [vmem:[%s140_s0] sm:$0x3] }
   0x8   :  { %38 = vmatpush.msra.mxu0 %v27_v3  ;;  %v60_v17 = vld [vmem:[%s139_s2] ss:$0 sm:$0xff] }
   0xa   :  { %39 = vmatpush.msra.mxu0 %v26_v4 }
   0xc   :  { %40 = vmatpush.msra.mxu0 %v25_v5 }
   0xe   :  { %41 = vmatpush.msra.mxu0 %v24_v6 }
  0x10   :  { %42 = vmatpush.msra.mxu0 %v23_v7 }
  0x12   :  { %43 = vmatpush.msra.mxu0 %v22_v8 }
  0x14   :  { %44 = vmatpush.msra.mxu0 %v21_v9 }
  0x16   :  { %45 = vmatpush.msra.mxu0 %v20_v10 }
  0x18   :  { %46 = vmatpush.msra.mxu0 %v19_v11 }
  0x1a   :  { %47 = vmatpush.msra.mxu0 %v18_v12 }
  0x1c   :  { %48 = vmatpush.msra.mxu0 %v17_v13 }
  0x1e   :  { %49 = vmatpush.msra.mxu0 %v16_v14 }
  0x20   :  { %50 = vmatpush.msra.mxu0 %v15_v15 }
  0x21   :  { %51 = vmatmul.f32.vlgmr.msra.gmra.mxu0 %v14_v16 }
  0x9e   :  { %v52_v18 = vpop.f32.mrf.mxu0 }
  0x9f   :  { %v53_v19 = vadd.f32 %v60_v17, %v52_v18 }
  0xa1   :  { %55 = vst [vmem:[%s141_s3] sm:$0x3] %v53_v19 }

</bundles_post_ra>
